<compile_context>
chip_gen: v7x
topology: tpu7x:2x2x1
jax: 0.10.0
libtpu: 0.0.40
codegen_flags: <defaults>
</compile_context>

<pallas_src>
import functools

import jax
import jax.numpy as jnp
from jax.experimental import pallas as pl
from jax.experimental.pallas import tpu as pltpu


# ----------------------------- kernel ---------------------------------------


def _layer_norm_kernel(ab_ref, x_ref, o_ref, *, eps, d):
    """Custom LayerNorm: alpha * (x - mean) / (std + eps) + bias.

    ab_ref : SMEM (2,) f32  -> [alpha, bias] scalars (scalar-prefetch)
    x_ref  : VMEM (TR, D)   -> row tile, full feature dim D on lanes
    """
    x = x_ref[...].astype(jnp.float32)                          # (TR, D)
    mean = jnp.sum(x, axis=-1, keepdims=True) * (1.0 / d)       # (TR, 1)
    xc = x - mean
    # PyTorch x.std(dim=-1) is the UNBIASED std (ddof = 1).
    # (d == 1 would be NaN in PyTorch; guard the static denominator here.)
    denom = d - 1 if d > 1 else 1
    var = jnp.sum(xc * xc, axis=-1, keepdims=True) * (1.0 / denom)
    std = jnp.sqrt(var)
    # Per-row reciprocal on the (TR,1) column keeps the hot (TR,D) path to one
    # mul + one add per element.  (approx=True would push this onto the EUP at
    # ~1e-4 relative error; keep exact to hold the 1e-5 reference tolerance.)
    inv = pl.reciprocal(std + eps, approx=False)                # (TR, 1)
    scale = ab_ref[0] * inv                                     # fold alpha in
    o_ref[...] = (xc * scale + ab_ref[1]).astype(o_ref.dtype)


# ----------------------------- tiling helper --------------------------------


def _row_tile(n_rows, d, itemsize):
    """VMEM-budget-aware, sublane-aligned row tile for an (n_rows, d) slab."""
    # Native sublane multiple: 8 for 32-bit, 16 for 16-bit, 32 for 8-bit dtypes.
    sub = {4: 8, 2: 16, 1: 32}.get(int(itemsize), 8)
    bytes_per_row = max(1, d * int(itemsize))
    # 2 streams (in + out) x 2 pipeline buffers = 4 live tiles in VMEM.
    vmem_budget = 12 * 1024 * 1024      # fits v5e 16MiB scoped default & v7x 64MiB
    live_tiles = 4
    cap = (vmem_budget // (live_tiles * bytes_per_row)) // sub * sub
    cap = int(max(sub, min(1024, cap)))
    # Aim for >= 8 grid steps (when rows allow) so megacore gets both TCs busy
    # and the ~0.35us/step overhead is still amortized by large-enough tiles.
    want = ((n_rows + 7) // 8 + sub - 1) // sub * sub
    want = int(max(sub, want))
    return min(cap, want)


# ----------------------------- wrappers -------------------------------------


def layer_norm(x, alpha, bias, *, eps=1e-5):
    """Pallas LayerNorm over the last dim with scalar alpha/bias (PyTorch semantics)."""
    orig_shape = x.shape
    d = int(orig_shape[-1])
    x2 = x.reshape(-1, d)                        # fold B*S -> sublane-dense rows
    n = x2.shape[0]
    itemsize = jnp.dtype(x.dtype).itemsize
    tr = _row_tile(n, d, itemsize)

    # Pad rows to a tile multiple (zero rows are safe: std+eps avoids NaN) and
    # slice the result back; avoids whole-array blocks / tiny-tile fallbacks.
    n_pad = pl.cdiv(n, tr) * tr
    if n_pad != n:
        x2 = jnp.pad(x2, ((0, n_pad - n), (0, 0)))

    ab = jnp.stack([jnp.asarray(alpha, jnp.float32).reshape(()),
                    jnp.asarray(bias, jnp.float32).reshape(())])   # (2,) -> SMEM

    kernel = functools.partial(_layer_norm_kernel, eps=float(eps), d=d)
    out = pl.pallas_call(
        kernel,
        out_shape=jax.ShapeDtypeStruct((n_pad, d), x.dtype),
        grid_spec=pltpu.PrefetchScalarGridSpec(
            num_scalar_prefetch=1,
            grid=(n_pad // tr,),
            in_specs=[pl.BlockSpec((tr, d), lambda i, ab: (i, 0))],
            out_specs=pl.BlockSpec((tr, d), lambda i, ab: (i, 0)),
        ),
        compiler_params=pltpu.CompilerParams(
            dimension_semantics=("parallel",)),
    )(ab, x2)

    if n_pad != n:
        out = out[:n]
    return out.reshape(orig_shape)


def residual_connection(x, sublayer, alpha, bias, *, eps=1e-5):
    """Forward pass of ResidualConnection: x + dropout(sublayer(LayerNorm(x)))."""
    # TODO(synk): nn.Dropout omitted (identity in eval mode); a training path
    # would fuse pltpu.prng_seed / prng_random_bits masking into the add.
    normed = layer_norm(x, alpha, bias, eps=eps)
    sub_out = sublayer(normed)      # arbitrary user callable -> stays in plain JAX
    # Residual add left to plain JAX so XLA fuses it into the sublayer's output
    # fusion — removes the extra HBM round trip a standalone Pallas add costs.
    return x + sub_out


# ----------------------------- reference & demo ------------------------------


def _reference(x, sublayer, alpha, bias, eps=1e-5):
    """Pure-JAX replication of the PyTorch module."""
    mean = x.mean(axis=-1, keepdims=True)
    std = jnp.std(x, axis=-1, keepdims=True, ddof=1)   # torch.std default: unbiased
    normed = alpha * (x - mean) / (std + eps) + bias
    return x + sublayer(normed)


if __name__ == "__main__":
    B, S, D = 2, 8, 32
    key = jax.random.PRNGKey(0)
    kx, kw, kb = jax.random.split(key, 3)

    x = jax.random.normal(kx, (B, S, D), jnp.float32)

    # ResidualConnection / LayerNorm parameters (PyTorch init values).
    alpha = jnp.ones((1,), jnp.float32)
    bias = jnp.zeros((1,), jnp.float32)

    # Example sublayer: a small feed-forward block (a plain callable, exactly as
    # the PyTorch module expects `sublayer` to be passed into forward()).
    w = jax.random.normal(kw, (D, D), jnp.float32) * (1.0 / jnp.sqrt(D))
    bw = jax.random.normal(kb, (D,), jnp.float32) * 0.02
    sublayer = lambda t: jnp.maximum(t @ w.T + bw, 0.0)

    out = residual_connection(x, sublayer, alpha, bias, eps=1e-5)
    out = jax.block_until_ready(out)

    ref = _reference(x, sublayer, alpha, bias, eps=1e-5)
    assert out.shape == x.shape
    assert jnp.allclose(out, ref, atol=1e-5, rtol=1e-5), \
        f"max abs err {jnp.max(jnp.abs(out - ref))}"

    print("KERNEL_OK")
</pallas_src>

<mosaic_0001>
module attributes {stable_mosaic.version = 11 : i64} {
  func.func @_layer_norm_kernel(%arg0: i32, %arg1: memref<2xf32, #tpu.memory_space<smem>>, %arg2: memref<8x32xf32, #tpu.memory_space<vmem>>, %arg3: memref<8x32xf32, #tpu.memory_space<vmem>>) attributes {dimension_semantics = [#tpu.dimension_semantics<parallel>], iteration_bounds = array<i64: 2>, scalar_prefetch = 1 : i64, scratch_operands = 0 : i64, tpu.core_type = #tpu.core_type<tc>, window_params = [{transform_indices = @transform_0, window_bounds = array<i64: 8, 32>}, {transform_indices = @transform_1, window_bounds = array<i64: 8, 32>}]} {
    %c0 = arith.constant 0 : index
    %c0_0 = arith.constant 0 : index
    %0 = vector.load %arg2[%c0, %c0_0] : memref<8x32xf32, #tpu.memory_space<vmem>>, vector<8x32xf32>
    %cst = arith.constant dense<0.000000e+00> : vector<8xf32>
    %1 = vector.multi_reduction <add>, %0, %cst [1] : vector<8x32xf32> to vector<8xf32>
    %2 = vector.shape_cast %1 : vector<8xf32> to vector<8x1xf32>
    %cst_1 = arith.constant 3.125000e-02 : f32
    %3 = vector.broadcast %cst_1 : f32 to vector<8x1xf32>
    %4 = arith.mulf %2, %3 : vector<8x1xf32>
    %5 = vector.broadcast %4 : vector<8x1xf32> to vector<8x32xf32>
    %6 = arith.subf %0, %5 : vector<8x32xf32>
    %7 = arith.mulf %6, %6 : vector<8x32xf32>
    %cst_2 = arith.constant dense<0.000000e+00> : vector<8xf32>
    %8 = vector.multi_reduction <add>, %7, %cst_2 [1] : vector<8x32xf32> to vector<8xf32>
    %9 = vector.shape_cast %8 : vector<8xf32> to vector<8x1xf32>
    %cst_3 = arith.constant 0.0322580636 : f32
    %10 = vector.broadcast %cst_3 : f32 to vector<8x1xf32>
    %11 = arith.mulf %9, %10 : vector<8x1xf32>
    %12 = math.sqrt %11 : vector<8x1xf32>
    %cst_4 = arith.constant 9.99999974E-6 : f32
    %13 = vector.broadcast %cst_4 : f32 to vector<8x1xf32>
    %14 = arith.addf %12, %13 : vector<8x1xf32>
    %15 = tpu.reciprocal %14 : vector<8x1xf32> -> vector<8x1xf32>
    %c0_5 = arith.constant 0 : index
    %16 = memref.load %arg1[%c0_5] : memref<2xf32, #tpu.memory_space<smem>>
    %17 = vector.broadcast %16 : f32 to vector<8x1xf32>
    %18 = arith.mulf %17, %15 : vector<8x1xf32>
    %19 = vector.broadcast %18 : vector<8x1xf32> to vector<8x32xf32>
    %20 = arith.mulf %6, %19 : vector<8x32xf32>
    %c1 = arith.constant 1 : index
    %21 = memref.load %arg1[%c1] : memref<2xf32, #tpu.memory_space<smem>>
    %22 = vector.broadcast %21 : f32 to vector<8x32xf32>
    %23 = arith.addf %20, %22 : vector<8x32xf32>
    %c0_6 = arith.constant 0 : index
    %c0_7 = arith.constant 0 : index
    %24 = vector.load %arg3[%c0_6, %c0_7] : memref<8x32xf32, #tpu.memory_space<vmem>>, vector<8x32xf32>
    tpu.vector_store %arg3[%c0_6, %c0_7], %23 {strides = array<i32>} : memref<8x32xf32, #tpu.memory_space<vmem>>, vector<8x32xf32>,
    return
  }
  func.func @transform_0(%arg0: i32, %arg1: memref<2xf32, #tpu.memory_space<smem>>) -> (i32, i32) {
    %c0_i32 = arith.constant 0 : i32
    %c0_i32_0 = arith.constant 0 : i32
    return %arg0, %c0_i32 : i32, i32
  }
  func.func @transform_1(%arg0: i32, %arg1: memref<2xf32, #tpu.memory_space<smem>>) -> (i32, i32) {
    %c0_i32 = arith.constant 0 : i32
    %c0_i32_0 = arith.constant 0 : i32
    return %arg0, %c0_i32 : i32, i32
  }
}

</mosaic_0001>

<bundles_post_ra>
// kernel: tpu_custom_call.1
= control target key start
LH: loop header
LB: loop body
LE: loop exit
PB: predicated region body
PF: predicated region fallthrough
CT: control target
= control target key end

     0   :  { %s622_s0 = inlined_call_operand.hbm [shape: f32[2], index: 0, kind: input, shape index: {}]   ;;  %s623_s1 = inlined_call_operand.hbm [shape: f32[16,32], index: 1, kind: input, shape index: {}]   ;;  %s624_s2 = inlined_call_operand.hbm [shape: f32[16,32], index: 2, kind: output, shape index: {}]  }
   0x1   :  { %s314_s11 = scalar_lea.hbm %s622_s0, 16 }
   0x2   :  { %p315_p0 = scmp.ne.s32.totalorder %s622_s0, %s314_s11  ;;  %p318_p1 = scmp.lt.u32.totalorder %s314_s11, %s622_s0 }
   0x4   :  { %p320_p2 = pnand %p318_p1, %p315_p0 }
   0x6   :  { %323 = shalt.err (!%p320_p2)  }
   0x7   :  { %s424_s16 = smov [#allocation3]  }
   0x8   :  { %8 = dma.hbm_to_smem %s622_s0, 16, %s424_s16, [#allocation2] }
   0x9   :  { %398 = dma.done.wait [#allocation2], 16 }
   0xa   :  { %399 = vsyncadd [#allocation2], 4294967280 }
   0xb   :  { %10 = sfence }
   0xc   :  { %11 = vsyncpa [#allocation5], 0 }
   0xd   :  { %13 = vsyncpa [#allocation5 + $0x1], 0 }
   0xe   :  { %14 = vsyncpa [#allocation6], 0 }
   0xf   :  { %16 = vsyncpa [#allocation6 + $0x1], 0  ;;  %s454_s19 = smov 0   ;;  %s456_s20 = smov 0  }
  0x10   :  { %s458_s21 = smov 0   ;;  %s460_s22 = smov 0  }
  0x11 LB: > { %s475_s0 = sadd.s32 4294967295, %s422_s22   ;;  %s250_s23 = sadd.s32 4294967294, %s422_s22   ;;  %s422_s22 = sphi %s460_s22, %s639_s22   ;;  %s418_s21 = sphi %s458_s21, %s638_s21   ;;  %s414_s20 = sphi %s456_s20, %s637_s20   ;;  %s410_s19 = sphi %s454_s19, %s636_s19  }
  0x12   : > { %s479_s24 = sadd.s32 1, %s422_s22   ;;  %s29_s25 = sadd.s32 1, %s418_s21 }
  0x13   : > { %s26_s26 = ssub.s32 %s422_s22, %s479_s24  ;;  %p36_p3 = scmp.ne.s32.totalorder %s418_s21, %s414_s20 }
  0x14   : > { %p27_p4 = scmp.eq.s32.totalorder %s26_s26, 0  ;;  %p37_p5 = scmp.eq.s32.totalorder %s422_s22, 0 }
  0x15   : > { %p42_p6 = scmp.ne.s32.totalorder %s414_s20, %s410_s19  ;;  %p43_p7 = scmp.eq.s32.totalorder %s475_s0, 0 }
  0x16   : > { %s491_s27 = scalar_select %p27_p4, %s418_s21, %s29_s25  }
  0x17   : > { %p493_p8 = por %p37_p5, %p36_p3  ;;  %p497_p9 = por %p43_p7, %p42_p6 }
  0x18   : > { %p66_p10 = scmp.eq.s32.totalorder %s475_s0, 1  ;;  %p72_p11 = scmp.eq.s32.totalorder %s250_s23, 1 }
  0x19   : > { %p275_p13 = scmp.lt.s32.totalorder %s422_s22, 2  ;;  %s92_s4 = sand.u32 1, %s418_s21  }
  0x1a   : > { %p504_p0 = por %p66_p10, %p36_p3  ;;  %p508_p1 = por %p72_p11, %p42_p6 }
  0x1b   : > { %s254_s5 = sshll.u32 %s422_s22, 7  ;;  %s253_s6 = sshll.u32 %s92_s4, 3 }
  0x1c   : > { %s628_s30 = scalar_select %p504_p0, 1, 0 }
  0x1d   : > { %s629_s3 = scalar_select %p508_p1, 1, 0 }
  0x1e   : > { %s517_s9 = scalar_lea.hbm %s623_s1, %s254_s5  ;;  %s96_s10 = scalar_lea.vmem [#allocation4], %s253_s6 }
  0x1f   : > { %s103_s11 = sshll.u32 %s96_s10, 4  ;;  %p521_p2 = pnand %p275_p13, %p493_p8  ;;  %s525_s11 = int_to_ptr.vmem [resolvable:$true] %s103_s11 }
  0x20   : > { %s93_s13 = scalar_lea.sflag [#allocation5], %s92_s4  ;;  %s324_s14 = scalar_lea.hbm %s517_s9, 128 }
  0x21   : > { %p325_p5 = scmp.ne.s32.totalorder %s517_s9, %s324_s14  ;;  %p326_p6 = pneg %p521_p2 }
  0x22   : > { %s329_s17 = scalar_lea.hbm %s623_s1, 256  ;;  %p330_p8 = scmp.lt.u32.totalorder %s517_s9, %s623_s1 }
  0x23   : > { %p327_p7 = pnand %p326_p6, %p325_p5  ;;  %p331_p11 = scmp.lt.u32.totalorder %s329_s17, %s324_s14 }
  0x24   : > { %p333_p12 = scmp.lt.u32.totalorder %s324_s14, %s517_s9 }
  0x25   : > { %p328_p10 = pneg %p327_p7  ;;  %p332_p13 = por %p331_p11, %p330_p8 }
  0x27   : > { %p334_p3 = por %p333_p12, %p332_p13 }
  0x29   : > { %p335_p4 = pnand %p334_p3, %p328_p10 }
  0x2b   : > { %338 = shalt.err (!%p335_p4)
}
  0x2c   : > { %s339_s25 = scalar_lea.vmem %s525_s11, 128  ;;  %s425_s26 = smov [#allocation4]  }
  0x2d   : > { %p340_p5 = scmp.ne.s32.totalorder %s525_s11, %s339_s25  ;;  %s344_s28 = sshll.u32 %s425_s26, 4  ;;  %s345_s28 = int_to_ptr.vmem [resolvable:$false] %s344_s28 }
  0x2e   : > { %s346_s4 = scalar_lea.vmem %s345_s28, 256  ;;  %p347_p0 = scmp.lt.s32.totalorder %s525_s11, %s345_s28 }
  0x2f   : > { %p342_p7 = pnand %p340_p5, %p326_p6  ;;  %p348_p8 = scmp.lt.s32.totalorder %s346_s4, %s339_s25 }
  0x31   : > { %p343_p1 = pneg %p342_p7  ;;  %p349_p11 = por %p348_p8, %p347_p0 }
  0x33   : > { %p350_p12 = pnand %p349_p11, %p343_p1 }
  0x35   : > { %353 = shalt.err (!%p350_p12)
}
  0x36   : > { %270 = dma.hbm_to_vmem [thread:$0]  (!%p521_p2), %s517_s9, 128, %s525_s11, %s93_s13  }
  0x37   : > { %p631_p3 = scmp.lt.s32.totalorder %s422_s22, 3  ;;  %p632_p4 = scmp.ge.s32.totalorder %s422_s22, 1 }
  0x39   : > { %p109_p6 = pnand %p632_p4, %p631_p3 }
  0x3a   : > { %s559_s5 = sand.u32 (!%p109_p6), 1, %s414_s20  }
  0x3b   : > { %112 = sbr.rel (%p109_p6) target bundleno = 410 (0x19a), region = 24  ;;  %s256_s6 = sshll.u32 (!%p109_p6), %s559_s5, 3 }
  0x3c   : > { %s115_s7 = scalar_lea.sflag (!%p109_p6), [#allocation5], %s559_s5  ;;  %s118_s8 = scalar_lea.vmem (!%p109_p6), [#allocation4], %s256_s6 }
  0x42   : > { %401 = dma.done.wait (%p497_p9), %s115_s7, 128  }
  0x43   : > { %403 = vsyncadd (%p497_p9), %s115_s7, 4294967168  ;;  %vm138_vm0 = vcmask 261120   ;;  %v137_v0 = vld [vmem:[%s118_s8] sm:$0xff]  ;;  %s158_s29 = sld [smem:[#allocation3]]  ;;  %s258_s9 = sld [smem:[#allocation3 + $0x1]] }
  0x44   : > { %v139_v1 = vsel %vm138_vm0, %v137_v0, 0.0  ;;  %s260_s10 = sshll.u32 %s475_s0, 7  ;;  %s136_s11 = scalar_lea.vmem [#allocation7], %s256_s6 }
  0x45   : > { %140 = vadd.xlane.f32.xlu0 %v139_v1  ;;  %s180_s12 = sshll.u32 %s136_s11, 4  ;;  %s577_s15 = scalar_lea.hbm %s624_s2, %s260_s10  ;;  %s579_s12 = int_to_ptr.vmem [resolvable:$true] %s180_s12 }
  0x46   : > { %s167_s16 = scalar_lea.sflag [#allocation6], %s559_s5  ;;  %s354_s17 = scalar_lea.vmem %s579_s12, 128 }
  0x47   : > { %p355_p9 = scmp.ne.s32.totalorder %s579_s12, %s354_s17  ;;  %p633_p0 = scmp.ne.s32.totalorder %s628_s30, 0 }
  0x48   : > { %s426_s0 = smov [#allocation7]  }
  0x49   : > { %v159_v15 = vstv %s158_s29  ;;  %v163_v18 = vstv %s258_s9  ;;  %p356_p1 = pnand %p355_p9, %p633_p0  ;;  %s358_s18 = sshll.u32 %s426_s0, 4  ;;  %s359_s18 = int_to_ptr.vmem [resolvable:$false] %s358_s18 }
  0x4a   : > { %s360_s23 = scalar_lea.vmem %s359_s18, 256  ;;  %p361_p10 = scmp.lt.s32.totalorder %s579_s12, %s359_s18 }
  0x4b   : > { %p357_p2 = pneg %p356_p1  ;;  %p362_p13 = scmp.lt.s32.totalorder %s360_s23, %s354_s17 }
  0x4d   : > { %p363_p5 = por %p362_p13, %p361_p10 }
  0x4f   : > { %p364_p7 = pnand %p363_p5, %p357_p2 }
  0xd2   : > { %v141_v2 = vpop.xlane.xlu0 %140 }
  0xd3   : > { %v142_v3 = vmul.f32 0.03125, %v141_v2 }
  0xd5   : > { %v143_v4 = vsub.f32 %v137_v0, %v142_v3 }
  0xd7   : > { %v144_v5 = vmul.f32 %v143_v4, %v143_v4 }
  0xd9   : > { %v145_v6 = vsel %vm138_vm0, %v144_v5, 0.0 }
  0xda   : > { %146 = vadd.xlane.f32.xlu0 %v145_v6 }
 0x167   : > { %v147_v7 = vpop.xlane.xlu0 %146 }
 0x168   : > { %v148_v8 = vmul.f32 0.032258064, %v147_v7 }
 0x16a   : > { %310 = vrsqrt.f32 %v148_v8  ;;  %vm151_vm1 = vcmp.eq.f32.partialorder %v148_v8, inf  ;;  %v154_v11 = vand.u32 2147483648, %v148_v8  ;;  %vm153_vm2 = vcmp.eq.f32.partialorder %v148_v8, 0.0 }
 0x174   : > { %v311_v9 = vpop.eup %310 }
 0x175   : > { %v150_v10 = vmul.f32 %v311_v9, %v148_v8 }
 0x177   : > { %v152_v12 = vsel %vm151_vm1, %v148_v8, %v150_v10 }
 0x178   : > { %v155_v13 = vsel %vm153_vm2, %v154_v11, %v152_v12 }
 0x179   : > { %v156_v14 = vadd.f32 1e-05, %v155_v13 }
 0x17b   : > { %312 = vrcp.f32 %v156_v14 }
 0x185   : > { %v313_v16 = vpop.eup %312 }
 0x186   : > { %v160_v17 = vmul.f32 %v313_v16, %v159_v15 }
 0x188   : > { %v161_v19 = vmul.f32 %v160_v17, %v143_v4 }
 0x18a   : > { %v164_v20 = vadd.f32 %v163_v18, %v161_v19 }
 0x18c   : > { %165 = vst.msk [vmem:[%s136_s11] sm:$0xff] %vm138_vm0, %v164_v20 }
 0x18d   : > { %367 = shalt.err (!%p364_p7)
}
 0x18e   : > { %s368_s25 = scalar_lea.hbm %s577_s15, 128  ;;  %s372_s4 = scalar_lea.hbm %s624_s2, 256 }
 0x18f   : > { %p369_p8 = scmp.ne.s32.totalorder %s577_s15, %s368_s25  ;;  %p373_p3 = scmp.lt.u32.totalorder %s577_s15, %s624_s2 }
 0x190   : > { %p374_p4 = scmp.lt.u32.totalorder %s372_s4, %s368_s25  ;;  %p376_p9 = scmp.lt.u32.totalorder %s368_s25, %s577_s15 }
 0x191   : > { %p370_p11 = pnand %p369_p8, %p633_p0 }
 0x192   : > { %p375_p6 = por %p374_p4, %p373_p3 }
 0x193   : > { %p371_p12 = pneg %p370_p11 }
 0x194   : > { %p377_p1 = por %p376_p9, %p375_p6 }
 0x196   : > { %p378_p2 = pnand %p377_p1, %p371_p12 }
 0x198   : > { %381 = shalt.err (!%p378_p2)
}
 0x199   : > { %265 = dma.vmem_to_hbm [thread:$0]  (%p633_p0), %s579_s12, 128, %s577_s15, %s167_s16  }
 0x19a PF: > { %s192_s7 = sand.u32 1, %s410_s19   ;;  %p634_p10 = scmp.ne.s32.totalorder %s629_s3, 0 }
 0x19b   : > { %p635_p13 = scmp.ge.s32.totalorder %s422_s22, 2  ;;  %s193_s8 = scalar_lea.sflag [#allocation6], %s192_s7 }
 0x19d   : > { %p272_p5 = pnand %p635_p13, %p634_p10 }
 0x19f   : > { %405 = dma.done.wait (!%p272_p5), %s193_s8, 128  }
 0x1a0   : > { %407 = vsyncadd (!%p272_p5), %s193_s8, 4294967168  ;;  %p19_p7 = scmp.ge.s32.totalorder %s479_s24, 4   ;;  %s636_s19 = smov %s414_s20 }
 0x1a1   : > { %s637_s20 = smov %s418_s21  ;;  %s638_s21 = smov %s491_s27 }
 0x1a2   : > { %s639_s22 = smov %s479_s24  ;;  %21 = sbr.rel (!%p19_p7) target bundleno = 17 (0x11), region = 69 }
 0x1a9   :  { %198 = vsyncpa [#allocation5], 1 }
 0x1aa   :  { %200 = vsyncpa [#allocation5 + $0x1], 1 }
 0x1ab   :  { %201 = vsyncpa [#allocation6], 1 }
 0x1ac   :  { %203 = vsyncpa [#allocation6 + $0x1], 1 }

</bundles_post_ra>
